<compile_context>
chip_gen: v7x
topology: tpu7x:2x2x1
jax: 0.10.0
libtpu: 0.0.40
codegen_flags: <defaults>
</compile_context>

<pallas_src>
import jax
import jax.numpy as jnp
from jax.experimental import pallas as pl
from jax.experimental.pallas import tpu as pltpu


def _round_up(n, m):
    return ((n + m - 1) // m) * m


def _disc_mlp_kernel(x_ref, w1_ref, b1_ref, w2_ref, b2_ref, w3_ref, b3_ref, o_ref):
    """Fused 3-layer MLP, feature-major (batch on lanes); one batch tile per step.

    x_ref  : (tile_m, nin)   f32   (batch-major HBM tile; cast to bf16 in-kernel)
    w1_ref : (nh1, nin)      bf16  (native nn.Linear layout, resident)
    b1_ref : (nh1, 1)        f32
    w2_ref : (nh2, nh1)      bf16
    b2_ref : (nh2, 1)        f32
    w3_ref : (nh2, 1)        f32   (w3 column, used on the VPU)
    b3_ref : (1, 1)          f32
    o_ref  : (1, 1, tile_m)  f32   lane-dense output row
    """
    x = x_ref[...].astype(jnp.bfloat16)                       # (tile_m, nin)

    # Layer 1 (NT matmul on the MXU): (nh1, nin) x (tile_m, nin)^T -> (nh1, tile_m)
    h1 = jax.lax.dot_general(
        w1_ref[...], x, (((1,), (1,)), ((), ())),
        preferred_element_type=jnp.float32)
    h1 = h1 + b1_ref[...]                                     # lane-broadcast bias
    h1 = jnp.maximum(h1, 0.2 * h1)                            # LeakyReLU(0.2)

    # Layer 2: (nh2, nh1) @ (nh1, tile_m) -> (nh2, tile_m)
    h2 = jnp.dot(w2_ref[...], h1.astype(jnp.bfloat16),
                 preferred_element_type=jnp.float32)
    h2 = h2 + b2_ref[...]
    h2 = jnp.maximum(h2, 0.2 * h2)

    # Layer 3 (nh2 -> 1) on VPU/XLU: weighted sublane reduce, stays lane-dense.
    h3 = jnp.sum(w3_ref[...] * h2, axis=0, keepdims=True) + b3_ref[...]   # (1, tile_m)

    # Sigmoid via a single EUP tanh: sigmoid(x) = 0.5 * (tanh(x/2) + 1)
    p = 0.5 * (jnp.tanh(0.5 * h3) + 1.0)

    o_ref[...] = p.reshape(o_ref.shape).astype(o_ref.dtype)


def _choose_tile_m(batch, requested):
    """Largest tile (multiple of 128) covering the padded batch, capped at
    `requested`.  No minimum-step heuristic: on single-TC chips (v5e/v6e) the
    grid is a sequential loop, so fewer/larger tiles are strictly better.
    For v7x megacore pass a smaller tile_m to get >=2 parallel grid steps."""
    b_pad = _round_up(max(batch, 1), 128)
    t = min(_round_up(max(requested, 1), 128), b_pad)
    return max(t, 128)


def discriminator_forward(x, params, *, nin, tile_m=4096):
    """params = (w1, b1, w2, b2, w3, b3) in native nn.Linear layout:
    w1 (nh1, nin), b1 (nh1,), w2 (nh2, nh1), b2 (nh2,), w3 (1, nh2), b3 (1,)."""
    w1, b1, w2, b2, w3, b3 = params
    nh1, nh2 = w1.shape[0], w2.shape[0]

    x2d = x.reshape(-1, nin)                      # x.view(-1, self.nin)
    batch = x2d.shape[0]

    tm = _choose_tile_m(batch, tile_m)
    num_tiles = pl.cdiv(batch, tm)
    b_pad = num_tiles * tm
    if b_pad != batch:                            # pad the tail tile, slice later
        # TODO(synk): for very large ragged batches, mask the last tile instead
        # of materializing a padded copy of x.
        x2d = jnp.pad(x2d, ((0, b_pad - batch), (0, 0)))

    # Tiny resident weights: bf16 for the MXU layers, f32 column for the VPU layer.
    w1b = w1.astype(jnp.bfloat16)
    w2b = w2.astype(jnp.bfloat16)
    w3c = w3.reshape(nh2, 1).astype(jnp.float32)
    b1c = b1.reshape(nh1, 1).astype(jnp.float32)
    b2c = b2.reshape(nh2, 1).astype(jnp.float32)
    b3c = b3.reshape(1, 1).astype(jnp.float32)

    flops = 2 * b_pad * (nin * nh1 + nh1 * nh2 + nh2)
    bytes_accessed = (b_pad * nin * 4 + b_pad * 4
                      + w1b.size * 2 + w2b.size * 2
                      + (w3c.size + b1c.size + b2c.size + b3c.size) * 4)

    out = pl.pallas_call(
        _disc_mlp_kernel,
        out_shape=jax.ShapeDtypeStruct((num_tiles, 1, tm), jnp.float32),
        grid_spec=pltpu.PrefetchScalarGridSpec(
            num_scalar_prefetch=0,
            grid=(num_tiles,),
            in_specs=[
                # batch-tiled activations (f32 straight from HBM)
                pl.BlockSpec((tm, nin), lambda i: (i, 0)),
                # small weights / biases, resident across grid steps
                pl.BlockSpec((nh1, nin), lambda i: (0, 0)),
                pl.BlockSpec((nh1, 1), lambda i: (0, 0)),
                pl.BlockSpec((nh2, nh1), lambda i: (0, 0)),
                pl.BlockSpec((nh2, 1), lambda i: (0, 0)),
                pl.BlockSpec((nh2, 1), lambda i: (0, 0)),
                pl.BlockSpec((1, 1), lambda i: (0, 0)),
            ],
            # lane-dense output: one (1, 1, tile_m) row per batch tile
            out_specs=pl.BlockSpec((1, 1, tm), lambda i: (i, 0, 0)),
        ),
        compiler_params=pltpu.CompilerParams(
            dimension_semantics=("parallel",),
        ),
        cost_estimate=pl.CostEstimate(
            flops=flops, transcendentals=b_pad, bytes_accessed=bytes_accessed),
    )(x2d, w1b, b1c, w2b, b2c, w3c, b3c)

    # (num_tiles, 1, tile_m) -> (B, 1)  (wrapper-side layout plumbing)
    return out.reshape(b_pad, 1)[:batch]


def init_discriminator_params(key, nin, nh1, nh2):
    """nn.Linear-style init, native (out, in) weight layout + (out,) biases."""
    ks = jax.random.split(key, 6)

    def lin(kw, kb, fan_in, fan_out):
        bound = 1.0 / jnp.sqrt(fan_in)
        w = jax.random.uniform(kw, (fan_out, fan_in), jnp.float32, -bound, bound)
        b = jax.random.uniform(kb, (fan_out,), jnp.float32, -bound, bound)
        return w, b

    w1, b1 = lin(ks[0], ks[1], nin, nh1)
    w2, b2 = lin(ks[2], ks[3], nh1, nh2)
    w3, b3 = lin(ks[4], ks[5], nh2, 1)
    return (w1, b1, w2, b2, w3, b3)


def _reference_forward(x, params, nin):
    """Pure-JAX reference mirroring the kernel's bf16-operand / f32-accum numerics."""
    w1, b1, w2, b2, w3, b3 = params
    bf = jnp.bfloat16
    h = x.reshape(-1, nin)
    h = jnp.dot(h.astype(bf), w1.T.astype(bf), preferred_element_type=jnp.float32) + b1
    h = jnp.maximum(h, 0.2 * h)
    h = jnp.dot(h.astype(bf), w2.T.astype(bf), preferred_element_type=jnp.float32) + b2
    h = jnp.maximum(h, 0.2 * h)
    h = jnp.dot(h, w3.T) + b3
    return jax.nn.sigmoid(h)


if __name__ == "__main__":
    # Small, module-consistent shapes: nin=64, nh1=32, nh2=16.
    nin, nh1, nh2 = 64, 32, 16

    key = jax.random.PRNGKey(0)
    kx, kp, kx2 = jax.random.split(key, 3)
    params = init_discriminator_params(kp, nin, nh1, nh2)

    # Case 1: tiny batch (B=16); internally padded to a single 128-row tile.
    x = jax.random.normal(kx, (16, nin), dtype=jnp.float32)
    out = jax.block_until_ready(discriminator_forward(x, params, nin=nin))
    ref = _reference_forward(x, params, nin)
    assert out.shape == (16, 1), out.shape
    assert jnp.allclose(out, ref, atol=5e-3, rtol=5e-3), float(jnp.max(jnp.abs(out - ref)))

    # Case 2: non-multiple batch + multi-tile grid (exercises padding + grid > 1).
    x2 = jax.random.normal(kx2, (300, nin), dtype=jnp.float32)
    out2 = jax.block_until_ready(discriminator_forward(x2, params, nin=nin, tile_m=128))
    ref2 = _reference_forward(x2, params, nin)
    assert out2.shape == (300, 1), out2.shape
    assert jnp.allclose(out2, ref2, atol=5e-3, rtol=5e-3), float(jnp.max(jnp.abs(out2 - ref2)))

    print("KERNEL_OK")
</pallas_src>

<mosaic_0001>
module attributes {stable_mosaic.version = 11 : i64} {
  func.func @_disc_mlp_kernel(%arg0: i32, %arg1: memref<128x64xf32, #tpu.memory_space<vmem>>, %arg2: memref<32x64xbf16, #tpu.memory_space<vmem>>, %arg3: memref<32x1xf32, #tpu.memory_space<vmem>>, %arg4: memref<16x32xbf16, #tpu.memory_space<vmem>>, %arg5: memref<16x1xf32, #tpu.memory_space<vmem>>, %arg6: memref<16x1xf32, #tpu.memory_space<vmem>>, %arg7: memref<1x1xf32, #tpu.memory_space<vmem>>, %arg8: memref<1x1x128xf32, #tpu.memory_space<vmem>>) attributes {dimension_semantics = [#tpu.dimension_semantics<parallel>], iteration_bounds = array<i64: 1>, scalar_prefetch = 0 : i64, scratch_operands = 0 : i64, tpu.core_type = #tpu.core_type<tc>, window_params = [{transform_indices = @transform_0, window_bounds = array<i64: 128, 64>}, {pipeline_mode = #tpu.pipeline_mode<synchronous>, transform_indices = @transform_1, window_bounds = array<i64: 32, 64>}, {pipeline_mode = #tpu.pipeline_mode<synchronous>, transform_indices = @transform_2, window_bounds = array<i64: 32, 1>}, {pipeline_mode = #tpu.pipeline_mode<synchronous>, transform_indices = @transform_3, window_bounds = array<i64: 16, 32>}, {pipeline_mode = #tpu.pipeline_mode<synchronous>, transform_indices = @transform_4, window_bounds = array<i64: 16, 1>}, {pipeline_mode = #tpu.pipeline_mode<synchronous>, transform_indices = @transform_5, window_bounds = array<i64: 16, 1>}, {pipeline_mode = #tpu.pipeline_mode<synchronous>, transform_indices = @transform_6, window_bounds = array<i64: 1, 1>}, {transform_indices = @transform_7, window_bounds = array<i64: 1, 1, 128>}]} {
    %c0 = arith.constant 0 : index
    %c0_0 = arith.constant 0 : index
    %0 = vector.load %arg1[%c0, %c0_0] : memref<128x64xf32, #tpu.memory_space<vmem>>, vector<128x64xf32>
    %1 = arith.truncf %0 : vector<128x64xf32> to vector<128x64xbf16>
    %c0_1 = arith.constant 0 : index
    %c0_2 = arith.constant 0 : index
    %2 = vector.load %arg2[%c0_1, %c0_2] : memref<32x64xbf16, #tpu.memory_space<vmem>>, vector<32x64xbf16>
    %cst = arith.constant dense<0.000000e+00> : vector<32x128xf32>
    %3 = tpu.matmul %2, %1, %cst {dimension_numbers = #tpu.dot_dimension_numbers<[1], [1], [0], [0], [0, 0, 1, 0], [], []>} : vector<32x64xbf16>, vector<128x64xbf16>, vector<32x128xf32> -> vector<32x128xf32>
    %c0_3 = arith.constant 0 : index
    %c0_4 = arith.constant 0 : index
    %4 = vector.load %arg3[%c0_3, %c0_4] : memref<32x1xf32, #tpu.memory_space<vmem>>, vector<32x1xf32>
    %5 = vector.broadcast %4 : vector<32x1xf32> to vector<32x128xf32>
    %6 = arith.addf %3, %5 : vector<32x128xf32>
    %cst_5 = arith.constant 2.000000e-01 : f32
    %7 = vector.broadcast %cst_5 : f32 to vector<32x128xf32>
    %8 = arith.mulf %7, %6 : vector<32x128xf32>
    %9 = arith.maximumf %6, %8 : vector<32x128xf32>
    %c0_6 = arith.constant 0 : index
    %c0_7 = arith.constant 0 : index
    %10 = vector.load %arg4[%c0_6, %c0_7] : memref<16x32xbf16, #tpu.memory_space<vmem>>, vector<16x32xbf16>
    %11 = arith.truncf %9 : vector<32x128xf32> to vector<32x128xbf16>
    %cst_8 = arith.constant dense<0.000000e+00> : vector<16x128xf32>
    %12 = tpu.matmul %10, %11, %cst_8 {dimension_numbers = #tpu.dot_dimension_numbers<[1], [0], [0], [1], [0, 0, 1, 1], [], []>} : vector<16x32xbf16>, vector<32x128xbf16>, vector<16x128xf32> -> vector<16x128xf32>
    %c0_9 = arith.constant 0 : index
    %c0_10 = arith.constant 0 : index
    %13 = vector.load %arg5[%c0_9, %c0_10] : memref<16x1xf32, #tpu.memory_space<vmem>>, vector<16x1xf32>
    %14 = vector.broadcast %13 : vector<16x1xf32> to vector<16x128xf32>
    %15 = arith.addf %12, %14 : vector<16x128xf32>
    %cst_11 = arith.constant 2.000000e-01 : f32
    %16 = vector.broadcast %cst_11 : f32 to vector<16x128xf32>
    %17 = arith.mulf %16, %15 : vector<16x128xf32>
    %18 = arith.maximumf %15, %17 : vector<16x128xf32>
    %c0_12 = arith.constant 0 : index
    %c0_13 = arith.constant 0 : index
    %19 = vector.load %arg6[%c0_12, %c0_13] : memref<16x1xf32, #tpu.memory_space<vmem>>, vector<16x1xf32>
    %20 = vector.broadcast %19 : vector<16x1xf32> to vector<16x128xf32>
    %21 = arith.mulf %20, %18 : vector<16x128xf32>
    %cst_14 = arith.constant dense<0.000000e+00> : vector<128xf32>
    %22 = vector.multi_reduction <add>, %21, %cst_14 [0] : vector<16x128xf32> to vector<128xf32>
    %23 = vector.shape_cast %22 : vector<128xf32> to vector<1x128xf32>
    %c0_15 = arith.constant 0 : index
    %c0_16 = arith.constant 0 : index
    %24 = vector.load %arg7[%c0_15, %c0_16] : memref<1x1xf32, #tpu.memory_space<vmem>>, vector<1x1xf32>
    %25 = vector.broadcast %24 : vector<1x1xf32> to vector<1x128xf32>
    %26 = arith.addf %23, %25 : vector<1x128xf32>
    %cst_17 = arith.constant 5.000000e-01 : f32
    %27 = vector.broadcast %cst_17 : f32 to vector<1x128xf32>
    %28 = arith.mulf %27, %26 : vector<1x128xf32>
    %29 = math.tanh %28 : vector<1x128xf32>
    %cst_18 = arith.constant 1.000000e+00 : f32
    %30 = vector.broadcast %cst_18 : f32 to vector<1x128xf32>
    %31 = arith.addf %29, %30 : vector<1x128xf32>
    %cst_19 = arith.constant 5.000000e-01 : f32
    %32 = vector.broadcast %cst_19 : f32 to vector<1x128xf32>
    %33 = arith.mulf %32, %31 : vector<1x128xf32>
    %34 = vector.shape_cast %33 : vector<1x128xf32> to vector<1x1x128xf32>
    %c0_20 = arith.constant 0 : index
    %c0_21 = arith.constant 0 : index
    %c0_22 = arith.constant 0 : index
    %35 = vector.load %arg8[%c0_20, %c0_21, %c0_22] : memref<1x1x128xf32, #tpu.memory_space<vmem>>, vector<1x1x128xf32>
    tpu.vector_store %arg8[%c0_20, %c0_21, %c0_22], %34 {strides = array<i32>} : memref<1x1x128xf32, #tpu.memory_space<vmem>>, vector<1x1x128xf32>,
    return
  }
  func.func @transform_0(%arg0: i32) -> (i32, i32) {
    %c0_i32 = arith.constant 0 : i32
    %c0_i32_0 = arith.constant 0 : i32
    return %arg0, %c0_i32 : i32, i32
  }
  func.func @transform_1(%arg0: i32) -> (i32, i32) {
    %c0_i32 = arith.constant 0 : i32
    %c0_i32_0 = arith.constant 0 : i32
    %c0_i32_1 = arith.constant 0 : i32
    return %c0_i32, %c0_i32_0 : i32, i32
  }
  func.func @transform_2(%arg0: i32) -> (i32, i32) {
    %c0_i32 = arith.constant 0 : i32
    %c0_i32_0 = arith.constant 0 : i32
    %c0_i32_1 = arith.constant 0 : i32
    return %c0_i32, %c0_i32_0 : i32, i32
  }
  func.func @transform_3(%arg0: i32) -> (i32, i32) {
    %c0_i32 = arith.constant 0 : i32
    %c0_i32_0 = arith.constant 0 : i32
    %c0_i32_1 = arith.constant 0 : i32
    return %c0_i32, %c0_i32_0 : i32, i32
  }
  func.func @transform_4(%arg0: i32) -> (i32, i32) {
    %c0_i32 = arith.constant 0 : i32
    %c0_i32_0 = arith.constant 0 : i32
    %c0_i32_1 = arith.constant 0 : i32
    return %c0_i32, %c0_i32_0 : i32, i32
  }
  func.func @transform_5(%arg0: i32) -> (i32, i32) {
    %c0_i32 = arith.constant 0 : i32
    %c0_i32_0 = arith.constant 0 : i32
    %c0_i32_1 = arith.constant 0 : i32
    return %c0_i32, %c0_i32_0 : i32, i32
  }
  func.func @transform_6(%arg0: i32) -> (i32, i32) {
    %c0_i32 = arith.constant 0 : i32
    %c0_i32_0 = arith.constant 0 : i32
    %c0_i32_1 = arith.constant 0 : i32
    return %c0_i32, %c0_i32_0 : i32, i32
  }
  func.func @transform_7(%arg0: i32) -> (i32, i32, i32) {
    %c0_i32 = arith.constant 0 : i32
    %c0_i32_0 = arith.constant 0 : i32
    %c0_i32_1 = arith.constant 0 : i32
    return %arg0, %c0_i32, %c0_i32_0 : i32, i32, i32
  }
}

</mosaic_0001>

<bundles_post_ra>
// kernel: tpu_custom_call.1
= control target key start
LH: loop header
LB: loop body
LE: loop exit
PB: predicated region body
PF: predicated region fallthrough
CT: control target
= control target key end

     0   :  { %s549_s0 = inlined_call_operand.vmem [shape: f32[128,64], index: 0, kind: input, shape index: {}]   ;;  %s550_s1 = inlined_call_operand.vmem [shape: bf16[32,64], index: 1, kind: input, shape index: {}]   ;;  %s551_s2 = inlined_call_operand.vmem [shape: f32[32,1], index: 2, kind: input, shape index: {}]   ;;  %s552_s3 = inlined_call_operand.vmem [shape: bf16[16,32], index: 3, kind: input, shape index: {}]   ;;  %s553_s4 = inlined_call_operand.vmem [shape: f32[16,1], index: 4, kind: input, shape index: {}]   ;;  %s554_s5 = inlined_call_operand.vmem [shape: f32[16,1], index: 5, kind: input, shape index: {}]   ;;  %s555_s6 = inlined_call_operand.<no memory space> [shape: f32[1,1], index: 6, kind: input, shape index: {}]   ;;  %s556_s7 = inlined_call_operand.hbm [shape: f32[1,1,128], index: 7, kind: output, shape index: {}]  }
   0x1   :  { %v12_v0 = vstv %s555_s6 }
   0x2   :  { %13 = vst [vmem:[#allocation2] sm:$0x1] %v12_v0 }
   0x3   :  { %v30_v1 = vld [vmem:[%s549_s0] sm:$0xff]  ;;  %v31_v2 = vld [vmem:[%s549_s0 + $0x8] sm:$0xff]  ;;  %vm92_vm0 = vcmask 523264   ;;  %v32_v3 = vld [vmem:[%s549_s0 + $0x10] sm:$0xff]  ;;  %v391_v6 = vmov 0  }
   0x4   :  { %v46_v4 = vpack.c.bf16 %v31_v2, %v30_v1  ;;  %v33_v5 = vld [vmem:[%s549_s0 + $0x18] sm:$0xff]  ;;  %360 = vset.pattern.permute.xlu0 %v391_v6  ;;  %361 = vset.pattern.permute.xlu1 %v391_v6  ;;  %v34_v9 = vld [vmem:[%s549_s0 + $0x20] sm:$0xff]  ;;  %v35_v10 = vld [vmem:[%s549_s0 + $0x28] sm:$0xff] }
   0x5   :  { %v47_v7 = vpack.c.bf16 %v33_v5, %v32_v3  ;;  %v362_v11 = vld [vmem:[%s550_s1] sm:$0xff]   ;;  %v60_v13 = vld [vmem:[%s551_s2 + $0x10] sm:$0xff]  ;;  %v48_v15 = vpack.c.bf16 %v35_v10, %v34_v9  ;;  %v59_v16 = vld [vmem:[%s551_s2 + $0x8] sm:$0xff] }
   0x6   :  { %348 = vmatprep.subr.msk.bf16.mxu0 %vm92_vm0, %v46_v4  ;;  %v100_v8 = vsel %vm92_vm0, %v46_v4, 0  ;;  %v58_v12 = vld [vmem:[%s551_s2] sm:$0xff]  ;;  %336 = vmatprep.mubr.msk.bf16.mxu0 %vm92_vm0, %v362_v11  ;;  %v61_v17 = vld [vmem:[%s551_s2 + $0x18] sm:$0xff] }
   0x7   :  { %321 = vmatpush3.bf16.xpose.msra.mxu0 %v100_v8  ;;  %64 = vperm.xlu0 %360, %v58_v12   ;;  %v103_v14 = vsel %vm92_vm0, %v47_v7, 0 }
   0x8   :  { %349 = vmatprep.subr.msk.bf16.mxu0 %vm92_vm0, %v47_v7  ;;  %74 = vperm.xlu1 %361, %v60_v13  }
   0x9   :  { %14 = vsyncpa [#allocation4], 0  ;;  %v184_v18 = vld [vmem:[%s553_s4] sm:$0xff]  ;;  %v36_v19 = vld [vmem:[%s549_s0 + $0x30] sm:$0xff]  ;;  %v106_v22 = vsel %vm92_vm0, %v48_v15, 0  ;;  %v392_v45 = vmov 0.0  }
   0xa   :  { %v37_v20 = vld [vmem:[%s549_s0 + $0x38] sm:$0xff]  ;;  %v185_v21 = vld [vmem:[%s553_s4 + $0x8] sm:$0xff]  ;;  %v250_v24 = vld [vmem:[%s554_s5] sm:$0xff]  ;;  %340 = vmatprep.subr.bf16.mxu1 %v392_v45  ;;  %vm393_vm1 = vmmov 0   ;;  %vm201_vm2 = vcmask 261120  }
   0xb   :  { %69 = vperm.xlu0 %360, %v59_v16   ;;  %v49_v23 = vpack.c.bf16 %v37_v20, %v36_v19  ;;  %v251_v25 = vld [vmem:[%s554_s5 + $0x8] sm:$0xff]  ;;  %v271_v26 = vld [vmem:[#allocation2] sm:$0x1]  ;;  %v40_v31 = vld [vmem:[%s549_s0 + $0x50] sm:$0xff]  ;;  %344 = vmatprep.mubr.msk.bf16.mxu1 %vm393_vm1, %v392_v45 }
   0xc   :  { %79 = vperm.xlu1 %361, %v61_v17   ;;  %v38_v27 = vld [vmem:[%s549_s0 + $0x40] sm:$0xff]  ;;  %v39_v28 = vld [vmem:[%s549_s0 + $0x48] sm:$0xff]  ;;  %v41_v32 = vld [vmem:[%s549_s0 + $0x58] sm:$0xff] }
   0xd   :  { %v109_v29 = vsel %vm92_vm0, %v49_v23, 0  ;;  %v50_v30 = vpack.c.bf16 %v39_v28, %v38_v27  ;;  %v51_v34 = vpack.c.bf16 %v41_v32, %v40_v31  ;;  %v42_v35 = vld [vmem:[%s549_s0 + $0x60] sm:$0xff]  ;;  %v43_v36 = vld [vmem:[%s549_s0 + $0x68] sm:$0xff]  ;;  %v44_v39 = vld [vmem:[%s549_s0 + $0x70] sm:$0xff] }
   0xe   :  { %v52_v38 = vpack.c.bf16 %v43_v36, %v42_v35  ;;  %v45_v40 = vld [vmem:[%s549_s0 + $0x78] sm:$0xff]  ;;  %v363_v44 = vld [vmem:[%s550_s1 + $0x8] sm:$0xff]   ;;  %v364_v4 = vld [vmem:[%s552_s3] sm:$0xff]   ;;  %s394_s3 = smov [#allocation3]  }
   0xf   :  { %323 = vmatpush3.bf16.xpose.msra.mxu0 %v103_v14  ;;  %188 = vperm.xlu0 %360, %v184_v18   ;;  %v112_v33 = vsel %vm92_vm0, %v50_v30, 0  ;;  %v115_v37 = vsel %vm92_vm0, %v51_v34, 0  ;;  %v53_v42 = vpack.c.bf16 %v45_v40, %v44_v39  ;;  %s293_s27 = sshll.u32 %s394_s3, 4  ;;  %s294_s27 = int_to_ptr.vmem [resolvable:$true] %s293_s27 }
  0x10   :  { %350 = vmatprep.subr.msk.bf16.mxu0 %vm92_vm0, %v48_v15  ;;  %193 = vperm.xlu1 %361, %v185_v21   ;;  %v118_v41 = vsel %vm92_vm0, %v52_v38, 0  ;;  %v277_v21 = vlaneseq  ;;  %s367_s28 = scalar_lea.vmem %s294_s27, 16  ;;  %s371_s29 = scalar_lea.vmem %s294_s27, 32 }
  0x11   :  { %v121_v43 = vsel %vm92_vm0, %v53_v42, 0  ;;  %p368_p0 = scmp.ne.s32.totalorder %s294_s27, %s367_s28  ;;  %p372_p1 = scmp.lt.s32.totalorder %s294_s27, %s294_s27 }
  0x12   :  { %p373_p2 = scmp.lt.s32.totalorder %s371_s29, %s367_s28 }
  0x13   :  { %254 = vperm.xlu0 %360, %v250_v24   ;;  %v278_v24 = vshrl.u32 %v277_v21, 7 }
  0x14   :  { %259 = vperm.xlu1 %361, %v251_v25   ;;  %p374_p3 = por %p373_p2, %p372_p1 }
  0x15   :  { %v279_v27 = vsub.s32 0, %v278_v24 }
  0x16   :  { %p375_p4 = pnand %p374_p3, %p368_p0 }
  0x17   :  { %325 = vmatpush3.bf16.xpose.msra.mxu0 %v106_v22  ;;  %274 = vperm.xlu0 %360, %v271_v26  }
  0x18   :  { %351 = vmatprep.subr.msk.bf16.mxu0 %vm92_vm0, %v49_v23 }
  0x1f   :  { %327 = vmatpush3.bf16.xpose.msra.mxu0 %v109_v29 }
  0x20   :  { %352 = vmatprep.subr.msk.bf16.mxu0 %vm92_vm0, %v50_v30 }
  0x27   :  { %329 = vmatpush3.bf16.xpose.msra.mxu0 %v112_v33 }
  0x28   :  { %353 = vmatprep.subr.msk.bf16.mxu0 %vm92_vm0, %v51_v34 }
  0x2f   :  { %331 = vmatpush3.bf16.xpose.msra.mxu0 %v115_v37 }
  0x30   :  { %354 = vmatprep.subr.msk.bf16.mxu0 %vm92_vm0, %v52_v38 }
  0x37   :  { %333 = vmatpush3.bf16.xpose.msra.mxu0 %v118_v41 }
  0x38   :  { %355 = vmatprep.subr.msk.bf16.mxu0 %vm92_vm0, %v53_v42 }
  0x3f   :  { %335 = vmatpush3.bf16.xpose.msra.mxu0 %v121_v43 }
  0x46   :  { %337 = vmatmul.mubr.msk.bf16.vlgmr.msra.gmra.mrb[0].mxu0 %vm92_vm0, %v363_v44 }
  0x86   :  { %v65_v47 = vpop.permute.xlu0 %64 }
  0x87   :  { %v75_v46 = vpop.permute.xlu1 %74 }
  0x8a   :  { %v70_v54 = vpop.permute.xlu0 %69 }
  0x8b   :  { %v80_v51 = vpop.permute.xlu1 %79 }
  0x8e   :  { %v189_v5 = vpop.permute.xlu0 %188 }
  0x8f   :  { %v194_v9 = vpop.permute.xlu1 %193 }
  0x92   :  { %v255_v17 = vpop.permute.xlu0 %254 }
  0x93   :  { %v260_v18 = vpop.permute.xlu1 %259 }
  0x96   :  { %v275_v29 = vpop.permute.xlu0 %274 }
  0x97   :  { %v280_v31 = vrot.slane %v275_v29, %v279_v27 }
 0x119   :  { %v338_v48 = vpop.f32.mrb[0].mxu0 }
 0x11a   :  { %v166_v49 = vadd.f32 %v338_v48, %v75_v46  ;;  %v157_v50 = vpop.f32.mrb[1].mxu0 }
 0x11b   :  { %v158_v52 = vadd.f32 %v157_v50, %v65_v47  ;;  %v339_v53 = vpop.f32.mrb[2].mxu0 }
 0x11c   :  { %v174_v55 = vmul.f32 0.2, %v166_v49  ;;  %v169_v56 = vadd.f32 %v339_v53, %v80_v51  ;;  %v160_v57 = vpop.f32.mrb[3].mxu0 }
 0x11d   :  { %v172_v58 = vmul.f32 0.2, %v158_v52  ;;  %v161_v59 = vadd.f32 %v160_v57, %v70_v54 }
 0x11e   :  { %v175_v60 = vmul.f32 0.2, %v169_v56  ;;  %v178_v62 = vmax.f32 %v166_v49, %v174_v55 }
 0x11f   :  { %v173_v61 = vmul.f32 0.2, %v161_v59  ;;  %v176_v0 = vmax.f32 %v158_v52, %v172_v58 }
 0x120   :  { %v179_v63 = vmax.f32 %v169_v56, %v175_v60 }
 0x121   :  { %v177_v1 = vmax.f32 %v161_v59, %v173_v61 }
 0x122   :  { %v183_v2 = vpack.c.bf16 %v179_v63, %v178_v62 }
 0x123   :  { %v182_v3 = vpack.c.bf16 %v177_v1, %v176_v0 }
 0x125   :  { %341 = vmatpush3.bf16.msra.mxu1 %v182_v3 }
 0x126   :  { %342 = vmatprep.subr.bf16.mxu1 %v392_v45 }
 0x129   :  { %343 = vmatpush3.bf16.msra.mxu1 %v183_v2 }
 0x12c   :  { %345 = vmatmul.mubr.msk.bf16.vlgmr.msra.gmra.mrb[0].mxu1 %vm201_vm2, %v364_v4 }
 0x1ff   :  { %v239_v6 = vpop.f32.mrb[0].mxu1 }
 0x200   :  { %v240_v7 = vadd.f32 %v239_v6, %v189_v5  ;;  %v346_v8 = vpop.f32.mrb[1].mxu1 }
 0x201   :  { %v242_v10 = vpop.f32.mrb[2].mxu1 }
 0x202   :  { %v246_v11 = vmul.f32 0.2, %v240_v7  ;;  %v243_v12 = vadd.f32 %v242_v10, %v194_v9  ;;  %v347_v13 = vpop.f32.mrb[3].mxu1 }
 0x204   :  { %v248_v14 = vmax.f32 %v240_v7, %v246_v11  ;;  %v247_v15 = vmul.f32 0.2, %v243_v12 }
 0x206   :  { %v249_v16 = vmax.f32 %v243_v12, %v247_v15  ;;  %v262_v19 = vmul.f32 %v255_v17, %v248_v14 }
 0x208   :  { %v263_v20 = vmul.f32 %v260_v18, %v249_v16 }
 0x20a   :  { %v264_v22 = vadd.f32 %v263_v20, %v262_v19 }
 0x20c   :  { %v265_v23 = vrot.slane %v264_v22, 4 }
 0x20e   :  { %v266_v25 = vadd.f32 %v265_v23, %v264_v22 }
 0x210   :  { %v267_v26 = vrot.slane %v266_v25, 2 }
 0x212   :  { %v268_v28 = vadd.f32 %v267_v26, %v266_v25 }
 0x214   :  { %v269_v30 = vrot.slane %v268_v28, 1 }
 0x216   :  { %v270_v32 = vadd.f32 %v269_v30, %v268_v28 }
 0x218   :  { %v281_v33 = vadd.f32 %v280_v31, %v270_v32 }
 0x21a   :  { %v282_v34 = vmul.f32 0.5, %v281_v33 }
 0x21c   :  { %365 = vtanh.f32 %v282_v34 }
 0x226   :  { %v366_v35 = vpop.eup %365 }
 0x227   :  { %v284_v36 = vadd.f32 1.0, %v366_v35 }
 0x229   :  { %v285_v37 = vmul.f32 0.5, %v284_v36 }
 0x22b   :  { %286 = vst [vmem:[#allocation3] sm:$0x1] %v285_v37 }
 0x22c   :  { %378 = shalt.err (!%p375_p4)
}
 0x22d   :  { %s379_s8 = scalar_lea.hbm %s556_s7, 16 }
 0x22e   :  { %p380_p5 = scmp.ne.s32.totalorder %s556_s7, %s379_s8  ;;  %p383_p6 = scmp.lt.u32.totalorder %s379_s8, %s556_s7 }
 0x230   :  { %p385_p7 = pnand %p383_p6, %p380_p5 }
 0x232   :  { %388 = shalt.err (!%p385_p7)
}
 0x233   :  { %296 = dma.vmem_to_hbm [thread:$0]  %s294_s27, 16, %s556_s7, [#allocation4]  }
 0x234   :  { %389 = dma.done.wait [#allocation4], 16  }
 0x235   :  { %390 = vsyncadd [#allocation4], 4294967280 }
 0x236   :  { %300 = vsyncpa [#allocation4], 1 }

</bundles_post_ra>
